<compile_context>
chip_gen: v7x
topology: tpu7x:2x2x1
jax: 0.10.0
libtpu: 0.0.40
codegen_flags: <defaults>
</compile_context>

<pallas_src>
import functools

import jax
import jax.numpy as jnp
from jax import lax
from jax.experimental import pallas as pl
from jax.experimental.pallas import tpu as pltpu

EPS = 1e-06
LANES = 128
ACC_SUBLANES = 8          # fixed (8, 128) f32 accumulator
NUM_CORES = 2             # leading "parallel" grid axis (used by v7x's 2 TCs)


def _default_block_rows_max():
    # 4096 rows = 2 MiB f32 per input block: 2 inputs x 2 pipeline buffers
    # = 8 MiB, inside v5e's 16 MiB scoped-VMEM default (and plenty for v6e).
    # On v7x (64 MiB physical VMEM, ~3.2 TB/s HBM) use 4 MiB blocks so the
    # per-grid-step fixed cost stays small relative to the HBM stream time.
    try:
        if pltpu.get_tpu_info().vmem_capacity_bytes <= 64 * 1024 * 1024:
            return 8192
    except Exception:
        pass
    return 4096


def _charbonnier_kernel(x_ref, y_ref, out_ref, acc_ref, *, eps, num_blocks,
                        steps_per_core, block_rows, tail_rows, c_tail, i_tail,
                        has_overhang):
    c = pl.program_id(0)          # core / parallel axis
    i = pl.program_id(1)          # sequential sweep axis

    @pl.when(i == 0)
    def _init():
        acc_ref[...] = jnp.zeros_like(acc_ref)

    d = x_ref[...].astype(jnp.float32) - y_ref[...].astype(jnp.float32)
    err = jnp.sqrt(d * d + jnp.float32(eps))

    def _accumulate(e):
        # Leading-axis sum -> plain VPU adds into the small resident accumulator.
        acc_ref[...] += e.reshape(-1, ACC_SUBLANES, LANES).sum(axis=0)

    # Trace-time flags (Python) pick the cheapest runtime predicates.
    needs_mask = tail_rows < block_rows
    in_range = (c * steps_per_core + i) < num_blocks if has_overhang else None

    if needs_mask:
        is_tail = jnp.logical_and(c == c_tail, i == i_tail)
        steady = jnp.logical_not(is_tail)
        if in_range is not None:
            steady = jnp.logical_and(in_range, steady)

        @pl.when(steady)
        def _steady():
            _accumulate(err)

        @pl.when(is_tail)
        def _tail():
            # Only whole trailing rows of the last block are invalid; mask them
            # with a block-local row index (no global int32 index -> no overflow).
            row = lax.broadcasted_iota(jnp.int32, (block_rows, LANES), 0)
            _accumulate(jnp.where(row < tail_rows, err, jnp.float32(0.0)))
    else:
        if in_range is None:
            _accumulate(err)
        else:
            @pl.when(in_range)
            def _steady():
                _accumulate(err)

    @pl.when(i == pl.num_programs(1) - 1)
    def _write():
        # Per-core partial accumulator; cross-lane reduce happens in the wrapper.
        out_ref[...] = acc_ref[...]


def l1_charbonnier_loss(x, y, eps=EPS, block_rows_max=None):
    assert x.shape == y.shape, (x.shape, y.shape)
    n = x.size
    if n == 0:
        return jnp.float32(0.0)

    xf = x.reshape(-1)
    yf = y.reshape(-1)

    # Dtype-aware layout unit so sub-32-bit inputs stay on packed-tile boundaries.
    itemsize = min(jnp.dtype(x.dtype).itemsize, jnp.dtype(y.dtype).itemsize)
    packing = max(1, 4 // int(itemsize))      # 1 (f32), 2 (bf16), 4 (8-bit)
    sublane_unit = 8 * packing
    pad_unit = sublane_unit * LANES

    # Aligned prefix goes through the kernel; the (< pad_unit)-element ragged
    # tail is reduced directly in XLA (avoids a full-array jnp.pad copy in HBM).
    n_main = (n // pad_unit) * pad_unit

    total = jnp.float32(0.0)

    if n_main:
        if block_rows_max is None:
            block_rows_max = _default_block_rows_max()
        block_rows_max = max(sublane_unit,
                             (block_rows_max // sublane_unit) * sublane_unit)

        rows = n_main // LANES
        block_rows = min(block_rows_max, rows)
        assert block_rows % sublane_unit == 0 and block_rows % ACC_SUBLANES == 0

        x2d = xf[:n_main].reshape(rows, LANES)
        y2d = yf[:n_main].reshape(rows, LANES)

        num_blocks = pl.cdiv(rows, block_rows)
        steps_per_core = pl.cdiv(num_blocks, NUM_CORES)
        has_overhang = steps_per_core * NUM_CORES > num_blocks
        tail_rows = rows - (num_blocks - 1) * block_rows
        c_tail = (num_blocks - 1) // steps_per_core
        i_tail = (num_blocks - 1) % steps_per_core

        if has_overhang:
            def in_index_map(c, i):
                # Clamp the (at most one) overhang step to a valid block; its
                # contribution is skipped inside the kernel.
                return (jnp.minimum(c * steps_per_core + i, num_blocks - 1), 0)
        else:
            def in_index_map(c, i):
                return (c * steps_per_core + i, 0)

        kernel = functools.partial(
            _charbonnier_kernel, eps=eps, num_blocks=num_blocks,
            steps_per_core=steps_per_core, block_rows=block_rows,
            tail_rows=tail_rows, c_tail=c_tail, i_tail=i_tail,
            has_overhang=has_overhang)

        partials = pl.pallas_call(
            kernel,
            out_shape=jax.ShapeDtypeStruct(
                (NUM_CORES * ACC_SUBLANES, LANES), jnp.float32),
            grid=(NUM_CORES, steps_per_core),
            in_specs=[
                pl.BlockSpec((block_rows, LANES), in_index_map),
                pl.BlockSpec((block_rows, LANES), in_index_map),
            ],
            out_specs=pl.BlockSpec((ACC_SUBLANES, LANES), lambda c, i: (c, 0)),
            scratch_shapes=[pltpu.VMEM((ACC_SUBLANES, LANES), jnp.float32)],
            compiler_params=pltpu.CompilerParams(
                dimension_semantics=("parallel", "arbitrary")),
        )(x2d, y2d)
        total = total + jnp.sum(partials)

    if n_main != n:
        xt = xf[n_main:].astype(jnp.float32)
        yt = yf[n_main:].astype(jnp.float32)
        dt = xt - yt
        total = total + jnp.sum(jnp.sqrt(dt * dt + jnp.float32(eps)))

    return total / jnp.float32(n)


def _reference(x, y, eps=EPS):
    d = x.astype(jnp.float32) - y.astype(jnp.float32)
    return jnp.mean(jnp.sqrt(d * d + eps))


if __name__ == "__main__":
    key = jax.random.PRNGKey(0)
    kx, ky = jax.random.split(key)

    # 1) Primary NCHW case: single block, aligned, f32.
    X = jax.random.normal(kx, (2, 4, 16, 16), dtype=jnp.float32)
    Y = jax.random.normal(ky, (2, 4, 16, 16), dtype=jnp.float32)
    loss = l1_charbonnier_loss(X, Y)
    jax.block_until_ready(loss)
    ref = _reference(X, Y)
    assert jnp.allclose(loss, ref, rtol=1e-5, atol=1e-6), (loss, ref)

    # 2) Multi-block with uneven 2-core split, an overhang step, and a partial
    #    (masked) last block: 5120 elems -> 40 rows, block_rows=16 -> 3 blocks.
    X2 = jax.random.normal(kx, (5, 4, 16, 16), dtype=jnp.float32)
    Y2 = jax.random.normal(ky, (5, 4, 16, 16), dtype=jnp.float32)
    loss2 = l1_charbonnier_loss(X2, Y2, block_rows_max=16)
    jax.block_until_ready(loss2)
    ref2 = _reference(X2, Y2)
    assert jnp.allclose(loss2, ref2, rtol=1e-5, atol=1e-6), (loss2, ref2)

    # 3) Ragged size (1155 elems): aligned prefix through the kernel,
    #    131-element tail reduced in XLA (no full-array pad copy).
    X3 = jax.random.normal(kx, (3, 5, 7, 11), dtype=jnp.float32)
    Y3 = jax.random.normal(ky, (3, 5, 7, 11), dtype=jnp.float32)
    loss3 = l1_charbonnier_loss(X3, Y3)
    jax.block_until_ready(loss3)
    ref3 = _reference(X3, Y3)
    assert jnp.allclose(loss3, ref3, rtol=1e-5, atol=1e-6), (loss3, ref3)

    # 4) bf16 inputs: packed-tile-aligned layout, in-kernel f32 cast/accumulate.
    X4 = jax.random.normal(kx, (2, 4, 16, 32), dtype=jnp.bfloat16)
    Y4 = jax.random.normal(ky, (2, 4, 16, 32), dtype=jnp.bfloat16)
    loss4 = l1_charbonnier_loss(X4, Y4)
    jax.block_until_ready(loss4)
    ref4 = _reference(X4, Y4)
    assert jnp.allclose(loss4, ref4, rtol=1e-4, atol=1e-5), (loss4, ref4)

    print("KERNEL_OK")
</pallas_src>

<mosaic_0001>
module attributes {stable_mosaic.version = 11 : i64} {
  func.func @_charbonnier_kernel(%arg0: i32, %arg1: i32, %arg2: memref<16x128xf32, #tpu.memory_space<vmem>>, %arg3: memref<16x128xf32, #tpu.memory_space<vmem>>, %arg4: memref<8x128xf32, #tpu.memory_space<vmem>>, %arg5: memref<8x128xf32, #tpu.memory_space<vmem>>) attributes {dimension_semantics = [#tpu.dimension_semantics<parallel>, #tpu.dimension_semantics<arbitrary>], iteration_bounds = array<i64: 2, 1>, scalar_prefetch = 0 : i64, scratch_operands = 1 : i64, tpu.core_type = #tpu.core_type<tc>, window_params = [{transform_indices = @transform_0, window_bounds = array<i64: 16, 128>}, {transform_indices = @transform_1, window_bounds = array<i64: 16, 128>}, {transform_indices = @transform_2, window_bounds = array<i64: 8, 128>}]} {
    %c0_i32 = arith.constant 0 : i32
    %0 = arith.cmpi eq, %arg1, %c0_i32 : i32
    %1 = arith.extui %0 : i1 to i32
    %c0_i32_0 = arith.constant 0 : i32
    %2 = arith.cmpi ne, %1, %c0_i32_0 : i32
    scf.if %2 {
      %cst_8 = arith.constant 0.000000e+00 : f32
      %18 = vector.broadcast %cst_8 : f32 to vector<8x128xf32>
      %c0_9 = arith.constant 0 : index
      %c0_10 = arith.constant 0 : index
      %19 = vector.load %arg5[%c0_9, %c0_10] : memref<8x128xf32, #tpu.memory_space<vmem>>, vector<8x128xf32>
      tpu.vector_store %arg5[%c0_9, %c0_10], %18 {strides = array<i32>} : memref<8x128xf32, #tpu.memory_space<vmem>>, vector<8x128xf32>,
    } else {
    }
    %c0 = arith.constant 0 : index
    %c0_1 = arith.constant 0 : index
    %3 = vector.load %arg2[%c0, %c0_1] : memref<16x128xf32, #tpu.memory_space<vmem>>, vector<16x128xf32>
    %c0_2 = arith.constant 0 : index
    %c0_3 = arith.constant 0 : index
    %4 = vector.load %arg3[%c0_2, %c0_3] : memref<16x128xf32, #tpu.memory_space<vmem>>, vector<16x128xf32>
    %5 = arith.subf %3, %4 : vector<16x128xf32>
    %6 = arith.mulf %5, %5 : vector<16x128xf32>
    %cst = arith.constant 9.99999997E-7 : f32
    %7 = vector.broadcast %cst : f32 to vector<16x128xf32>
    %8 = arith.addf %6, %7 : vector<16x128xf32>
    %9 = math.sqrt %8 : vector<16x128xf32>
    %c1_i32 = arith.constant 1 : i32
    %10 = arith.muli %arg0, %c1_i32 : i32
    %11 = arith.addi %10, %arg1 : i32
    %c1_i32_4 = arith.constant 1 : i32
    %12 = arith.cmpi slt, %11, %c1_i32_4 : i32
    %13 = arith.extui %12 : i1 to i32
    %c0_i32_5 = arith.constant 0 : i32
    %14 = arith.cmpi ne, %13, %c0_i32_5 : i32
    scf.if %14 {
      %c0_8 = arith.constant 0 : index
      %c0_9 = arith.constant 0 : index
      %18 = vector.load %arg5[%c0_8, %c0_9] : memref<8x128xf32, #tpu.memory_space<vmem>>, vector<8x128xf32>
      %19 = vector.shape_cast %9 : vector<16x128xf32> to vector<2x8x128xf32>
      %cst_10 = arith.constant dense<0.000000e+00> : vector<8x128xf32>
      %20 = vector.multi_reduction <add>, %19, %cst_10 [0] : vector<2x8x128xf32> to vector<8x128xf32>
      %21 = arith.addf %18, %20 : vector<8x128xf32>
      %c0_11 = arith.constant 0 : index
      %c0_12 = arith.constant 0 : index
      %22 = vector.load %arg5[%c0_11, %c0_12] : memref<8x128xf32, #tpu.memory_space<vmem>>, vector<8x128xf32>
      tpu.vector_store %arg5[%c0_11, %c0_12], %21 {strides = array<i32>} : memref<8x128xf32, #tpu.memory_space<vmem>>, vector<8x128xf32>,
    } else {
    }
    %c0_i32_6 = arith.constant 0 : i32
    %15 = arith.cmpi eq, %arg1, %c0_i32_6 : i32
    %16 = arith.extui %15 : i1 to i32
    %c0_i32_7 = arith.constant 0 : i32
    %17 = arith.cmpi ne, %16, %c0_i32_7 : i32
    scf.if %17 {
      %c0_8 = arith.constant 0 : index
      %c0_9 = arith.constant 0 : index
      %18 = vector.load %arg5[%c0_8, %c0_9] : memref<8x128xf32, #tpu.memory_space<vmem>>, vector<8x128xf32>
      %c0_10 = arith.constant 0 : index
      %c0_11 = arith.constant 0 : index
      %19 = vector.load %arg4[%c0_10, %c0_11] : memref<8x128xf32, #tpu.memory_space<vmem>>, vector<8x128xf32>
      tpu.vector_store %arg4[%c0_10, %c0_11], %18 {strides = array<i32>} : memref<8x128xf32, #tpu.memory_space<vmem>>, vector<8x128xf32>,
    } else {
    }
    return
  }
  func.func @transform_0(%arg0: i32, %arg1: i32) -> (i32, i32) {
    %c1_i32 = arith.constant 1 : i32
    %0 = arith.muli %arg0, %c1_i32 : i32
    %1 = arith.addi %0, %arg1 : i32
    %c0_i32 = arith.constant 0 : i32
    %2 = arith.minsi %1, %c0_i32 : i32
    %c0_i32_0 = arith.constant 0 : i32
    %c0_i32_1 = arith.constant 0 : i32
    return %2, %c0_i32_0 : i32, i32
  }
  func.func @transform_1(%arg0: i32, %arg1: i32) -> (i32, i32) {
    %c1_i32 = arith.constant 1 : i32
    %0 = arith.muli %arg0, %c1_i32 : i32
    %1 = arith.addi %0, %arg1 : i32
    %c0_i32 = arith.constant 0 : i32
    %2 = arith.minsi %1, %c0_i32 : i32
    %c0_i32_0 = arith.constant 0 : i32
    %c0_i32_1 = arith.constant 0 : i32
    return %2, %c0_i32_0 : i32, i32
  }
  func.func @transform_2(%arg0: i32, %arg1: i32) -> (i32, i32) {
    %c0_i32 = arith.constant 0 : i32
    %c0_i32_0 = arith.constant 0 : i32
    return %arg0, %c0_i32 : i32, i32
  }
}

</mosaic_0001>

<bundles_post_ra>
// kernel: tpu_custom_call.1
= control target key start
LH: loop header
LB: loop body
LE: loop exit
PB: predicated region body
PF: predicated region fallthrough
CT: control target
= control target key end

     0   :  { %7 = vsyncpa [#allocation4], 0  ;;  %s912_s0 = inlined_call_operand.hbm [shape: f32[16,128], index: 0, kind: input, shape index: {}]   ;;  %s913_s1 = inlined_call_operand.hbm [shape: f32[16,128], index: 1, kind: input, shape index: {}]   ;;  %s914_s2 = inlined_call_operand.hbm [shape: f32[16,128], index: 2, kind: output, shape index: {}]  }
   0x1   :  { %9 = vsyncpa [#allocation4 + $0x1], 0 }
   0x2   :  { %10 = vsyncpa [#allocation7], 0 }
   0x3   :  { %12 = vsyncpa [#allocation7 + $0x1], 0 }
   0x4   :  { %13 = vsyncpa [#allocation5], 0 }
   0x5   :  { %15 = vsyncpa [#allocation5 + $0x1], 0  ;;  %s707_s9 = smov 0   ;;  %s709_s10 = smov 0  }
   0x6   :  { %s711_s11 = smov 0   ;;  %s713_s12 = smov 0  }
   0x7   :  { %s715_s13 = smov 0   ;;  %s717_s14 = smov 0  }
   0x8   :  { %s719_s15 = smov 0   ;;  %s721_s16 = smov 0  }
   0x9 LB: > { %s398_s17 = sadd.s32 4294967295, %s684_s16   ;;  %s399_s18 = sadd.s32 4294967294, %s684_s16   ;;  %s684_s16 = sphi %s721_s16, %s21_s16   ;;  %s680_s15 = sphi %s719_s15, %s933_s15   ;;  %s676_s14 = sphi %s717_s14, %s932_s14   ;;  %s672_s13 = sphi %s715_s13, %s902_s13   ;;  %s668_s12 = sphi %s713_s12, %s931_s12   ;;  %s664_s11 = sphi %s711_s11, %s930_s11   ;;  %s660_s10 = sphi %s709_s10, %s929_s10   ;;  %s656_s9 = sphi %s707_s9, %s928_s9  }
   0xa   : > { %s33_s19 = sadd.s32 1, %s680_s15  ;;  %p653_p1 = scmp.ne.s32.totalorder %s672_s13, 0 }
   0xb   : > { %p35_p0 = scmp.ge.s32.totalorder %s33_s19, 2  ;;  %p54_p2 = scmp.eq.s32.totalorder %s684_s16, 0 }
   0xc   : > { %p59_p3 = scmp.ne.s32.totalorder %s672_s13, %s668_s12  ;;  %p60_p5 = scmp.eq.s32.totalorder %s398_s17, 0 }
   0xd   : > { %s935_s19 = smov (%p35_p0, %s33_s19), 0  ;;  %p753_p4 = por %p653_p1, %p54_p2 }
   0xe   : > { %p757_p6 = por %p60_p5, %p59_p3  ;;  %s101_s22 = ssub.s32 %s680_s15, %s935_s19 }
   0xf   : > { %p102_p7 = scmp.eq.s32.totalorder %s101_s22, 0  ;;  %s104_s23 = sadd.s32 1, %s664_s11 }
  0x10   : > { %s918_s21 = scalar_select %p757_p6, 1, 0 }
  0x11   : > { %s765_s24 = scalar_select %p102_p7, %s664_s11, %s104_s23  }
  0x12   : > { %p114_p8 = scmp.ne.s32.totalorder %s664_s11, %s660_s10  ;;  %p115_p9 = scmp.eq.s32.totalorder %s398_s17, 1 }
  0x13   : > { %p120_p10 = scmp.ne.s32.totalorder %s660_s10, %s656_s9  ;;  %p121_p11 = scmp.eq.s32.totalorder %s399_s18, 1 }
  0x14   : > { %p771_p12 = por %p115_p9, %p114_p8  ;;  %p436_p1 = scmp.lt.s32.totalorder %s684_s16, 2 }
  0x15   : > { %p776_p0 = por %p121_p11, %p120_p10  ;;  %s686_s27 = smov [#allocation3]  }
  0x16   : > { %s919_s25 = scalar_select %p771_p12, 1, 0 }
  0x17   : > { %s920_s26 = scalar_select %p776_p0, 1, 0 }
  0x18   : > { %s155_s28 = sshll.u32 %s686_s27, 4  ;;  %p783_p2 = pnand %p436_p1, %p753_p4  ;;  %s156_s28 = int_to_ptr.vmem [resolvable:$true] %s155_s28 }
  0x19   : > { %s517_s4 = scalar_lea.hbm %s912_s0, 256 }
  0x1a   : > { %p518_p3 = scmp.ne.s32.totalorder %s912_s0, %s517_s4  ;;  %p519_p5 = pneg %p783_p2 }
  0x1b   : > { %p524_p8 = scmp.lt.u32.totalorder %s517_s4, %s517_s4  ;;  %p526_p9 = scmp.lt.u32.totalorder %s517_s4, %s912_s0 }
  0x1c   : > { %p520_p7 = pnand %p519_p5, %p518_p3 }
  0x1d   : > { %p527_p10 = por %p526_p9, %p524_p8 }
  0x1e   : > { %p521_p4 = pneg %p520_p7 }
  0x20   : > { %p528_p11 = pnand %p527_p10, %p521_p4 }
  0x22   : > { %531 = shalt.err (!%p528_p11)
}
  0x23   : > { %s532_s12 = scalar_lea.vmem %s156_s28, 256  ;;  %s539_s17 = scalar_lea.vmem %s156_s28, 512 }
  0x24   : > { %p533_p1 = scmp.ne.s32.totalorder %s156_s28, %s532_s12  ;;  %p540_p12 = scmp.lt.s32.totalorder %s156_s28, %s156_s28 }
  0x25   : > { %p541_p6 = scmp.lt.s32.totalorder %s539_s17, %s532_s12 }
  0x26   : > { %p535_p13 = pnand %p533_p1, %p519_p5 }
  0x27   : > { %p542_p3 = por %p541_p6, %p540_p12 }
  0x28   : > { %p536_p0 = pneg %p535_p13 }
  0x2a   : > { %p543_p7 = pnand %p542_p3, %p536_p0 }
  0x2c   : > { %546 = shalt.err (!%p543_p7)
}
  0x2d   : > { %s687_s18 = smov 128   ;;  %s688_s20 = smov 8  }
  0x2e   : > { %428 = dma.hbm_to_vmem [thread:$0]  (!%p783_p2), %s912_s0, 256, %s156_s28, [#allocation4], %s687_s18, %s687_s18, %s688_s20  }
  0x2f   : > { %p408_p13 = scmp.ge.s32.totalorder %s684_s16, 1  ;;  %p187_p4 = scmp.lt.s32.totalorder %s684_s16, 3 }
  0x30   : > { %s689_s30 = smov [#allocation6]   ;;  %s547_s6 = scalar_lea.hbm %s913_s1, 256 }
  0x31   : > { %p814_p8 = pnand %p408_p13, %p187_p4  ;;  %s179_s3 = sshll.u32 %s689_s30, 4  ;;  %s180_s3 = int_to_ptr.vmem [resolvable:$true] %s179_s3 }
  0x32   : > { %p548_p6 = scmp.ne.s32.totalorder %s913_s1, %s547_s6  ;;  %p554_p9 = scmp.lt.u32.totalorder %s547_s6, %s547_s6 }
  0x33   : > { %s922_s27 = scalar_select %p814_p8, 1, 0 }
  0x34   : > { %p550_p12 = pnand %p548_p6, %p519_p5  ;;  %p556_p10 = scmp.lt.u32.totalorder %s547_s6, %s913_s1 }
  0x36   : > { %p551_p0 = pneg %p550_p12  ;;  %p557_p11 = por %p556_p10, %p554_p9 }
  0x38   : > { %p558_p1 = pnand %p557_p11, %p551_p0 }
  0x3a   : > { %561 = shalt.err (!%p558_p1)
}
  0x3b   : > { %s562_s17 = scalar_lea.vmem %s180_s3, 256  ;;  %s569_s22 = scalar_lea.vmem %s180_s3, 512 }
  0x3c   : > { %p563_p3 = scmp.ne.s32.totalorder %s180_s3, %s562_s17  ;;  %p570_p4 = scmp.lt.s32.totalorder %s180_s3, %s180_s3 }
  0x3d   : > { %p571_p8 = scmp.lt.s32.totalorder %s569_s22, %s562_s17 }
  0x3e   : > { %p565_p7 = pnand %p563_p3, %p519_p5 }
  0x3f   : > { %p572_p6 = por %p571_p8, %p570_p4 }
  0x40   : > { %p566_p13 = pneg %p565_p7 }
  0x42   : > { %p573_p12 = pnand %p572_p6, %p566_p13 }
  0x44   : > { %576 = shalt.err (!%p573_p12)
}
  0x45   : > { %431 = dma.hbm_to_vmem [thread:$0]  (!%p783_p2), %s913_s1, 256, %s180_s3, [#allocation7], %s687_s18, %s687_s18, %s688_s20  }
  0x46   : > { %p923_p0 = scmp.ne.s32.totalorder %s922_s27, 0 }
  0x47   : > { %s193_s4 = sand.u32 (!%p923_p0), 1, %s672_s13   ;;  %p924_p5 = scmp.ne.s32.totalorder (!%p923_p0), %s918_s21, 0 }
  0x48   : > { %191 = sbr.rel (%p923_p0) target bundleno = 136 (0x88), region = 28  ;;  %s409_s5 = sshll.u32 (!%p923_p0), %s193_s4, 4 }
  0x49   : > { %s194_s6 = scalar_lea.sflag (!%p923_p0), [#allocation4], %s193_s4  ;;  %s197_s7 = scalar_lea.vmem (!%p923_p0), [#allocation3], %s409_s5 }
  0x4f   : > { %642 = dma.done.wait (%p924_p5), %s194_s6, 256  }
  0x50   : > { %644 = vsyncadd (%p924_p5), %s194_s6, 4294967040  ;;  %s203_s29 = scalar_lea.sflag [#allocation7], %s193_s4  ;;  %s206_s8 = scalar_lea.vmem [#allocation6], %s409_s5 }
  0x51   : > { %646 = dma.done.wait (%p924_p5), %s203_s29, 256  }
  0x52   : > { %648 = vsyncadd (%p924_p5), %s203_s29, 4294967040  ;;  %s229_s18 = sand.u32 1, %s660_s10   ;;  %v690_v0 = vmov 0.0   ;;  %v245_v1 = vld [vmem:[%s197_s7] sm:$0xff]  ;;  %v246_v2 = vld [vmem:[%s197_s7 + $0x8] sm:$0xff]  ;;  %p412_p2 = scmp.ge.s32.totalorder %s676_s14, 1 }
  0x53   : > { %s855_s20 = sshll.u32 %s229_s18, 3  ;;  %244 = vst [vmem:[#allocation2] sm:$0xff] %v690_v0  ;;  %v247_v3 = vld [vmem:[%s206_s8] sm:$0xff]  ;;  %v248_v4 = vld [vmem:[%s206_s8 + $0x8] sm:$0xff] }
  0x54   : > { %v249_v5 = vsub.f32 %v245_v1, %v247_v3  ;;  %v250_v6 = vsub.f32 %v246_v2, %v248_v4  ;;  %s231_s21 = scalar_lea.vmem [#allocation8], %s855_s20 }
  0x56   : > { %v251_v7 = vmul.f32 %v249_v5, %v249_v5  ;;  %v252_v8 = vmul.f32 %v250_v6, %v250_v6 }
  0x58   : > { %v253_v9 = vadd.f32 1e-06, %v251_v7  ;;  %v254_v10 = vadd.f32 1e-06, %v252_v8 }
  0x5a   : > { %513 = vrsqrt.f32 %v253_v9  ;;  %vm257_vm0 = vcmp.eq.f32.partialorder %v253_v9, inf  ;;  %v260_v12 = vand.u32 2147483648, %v253_v9  ;;  %vm259_vm1 = vcmp.eq.f32.partialorder %v253_v9, 0.0  ;;  %v274_v21 = vld [vmem:[#allocation2] sm:$0xff] (!%p412_p2) }
  0x5b   : > { %515 = vrsqrt.f32 %v254_v10  ;;  %vm264_vm2 = vcmp.eq.f32.partialorder %v254_v10, inf  ;;  %v267_v15 = vand.u32 2147483648, %v254_v10  ;;  %vm266_vm3 = vcmp.eq.f32.partialorder %v254_v10, 0.0 }
  0x63   : > { %273 = sbr.rel (%p412_p2) target bundleno = 111 (0x6f), region = 44 }
  0x64   : > { %v514_v11 = vpop.eup %513 }
  0x65   : > { %v516_v13 = vpop.eup %515  ;;  %v256_v14 = vmul.f32 %v514_v11, %v253_v9 }
  0x66   : > { %v263_v16 = vmul.f32 %v516_v13, %v254_v10 }
  0x67   : > { %v258_v17 = vsel %vm257_vm0, %v253_v9, %v256_v14 }
  0x68   : > { %v261_v18 = vsel %vm259_vm1, %v260_v12, %v258_v17  ;;  %v265_v19 = vsel %vm264_vm2, %v254_v10, %v263_v16 }
  0x69   : > { %v268_v20 = vsel %vm266_vm3, %v267_v15, %v265_v19 }
  0x6a   : > { %v275_v22 = vadd.f32 %v268_v20, %v261_v18 }
  0x6c   : > { %v276_v23 = vadd.f32 %v275_v22, %v274_v21 }
  0x6e   : > { %277 = vst [vmem:[#allocation2] sm:$0xff] %v276_v23 }
  0x6f PF: > { %s414_s27 = sshll.u32 %s676_s14, 7  ;;  %s297_s17 = sshll.u32 %s231_s21, 4  ;;  %s298_s17 = int_to_ptr.vmem [resolvable:$true] %s297_s17 }
  0x70   : > { %s863_s12 = scalar_lea.hbm %s914_s2, %s414_s27  ;;  %s284_s22 = scalar_lea.sflag [#allocation5], %s229_s18 }
  0x71   : > { %s577_s23 = scalar_lea.vmem %s298_s17, 128  ;;  %p925_p9 = scmp.ne.s32.totalorder %s919_s25, 0 }
  0x72   : > { %p578_p8 = scmp.ne.s32.totalorder %s298_s17, %s577_s23  ;;  %s691_s30 = smov [#allocation8]  }
  0x73   : > { %s581_s4 = sshll.u32 %s691_s30, 4  ;;  %s582_s4 = int_to_ptr.vmem [resolvable:$false] %s581_s4 }
  0x74   : > { %p579_p10 = pnand %p578_p8, %p925_p9  ;;  %s583_s5 = scalar_lea.vmem %s582_s4, 256 }
  0x75   : > { %v281_v24 = vld [vmem:[#allocation2] sm:$0xff]  ;;  %p584_p1 = scmp.lt.s32.totalorder %s298_s17, %s582_s4  ;;  %p585_p3 = scmp.lt.s32.totalorder %s583_s5, %s577_s23 }
  0x76   : > { %282 = vst [vmem:[%s231_s21] sm:$0xff] %v281_v24  ;;  %p580_p11 = pneg %p579_p10 }
  0x77   : > { %p586_p7 = por %p585_p3, %p584_p1 }
  0x79   : > { %p587_p13 = pnand %p586_p7, %p580_p11 }
  0x7b   : > { %590 = shalt.err (!%p587_p13)
}
  0x7c   : > { %s591_s14 = scalar_lea.hbm %s863_s12, 128  ;;  %s595_s29 = scalar_lea.hbm %s914_s2, 256 }
  0x7d   : > { %p592_p4 = scmp.ne.s32.totalorder %s863_s12, %s591_s14  ;;  %p596_p0 = scmp.lt.u32.totalorder %s863_s12, %s914_s2 }
  0x7e   : > { %p597_p5 = scmp.lt.u32.totalorder %s595_s29, %s591_s14  ;;  %p599_p8 = scmp.lt.u32.totalorder %s591_s14, %s863_s12 }
  0x7f   : > { %p593_p6 = pnand %p592_p4, %p925_p9 }
  0x80   : > { %p598_p2 = por %p597_p5, %p596_p0 }
  0x81   : > { %p594_p12 = pneg %p593_p6 }
  0x82   : > { %p600_p10 = por %p599_p8, %p598_p2 }
  0x84   : > { %p601_p11 = pnand %p600_p10, %p594_p12 }
  0x86   : > { %604 = shalt.err (!%p601_p11)
}
  0x87   : > { %423 = dma.vmem_to_hbm [thread:$0]  (%p925_p9), %s298_s17, 128, %s863_s12, %s284_s22  }
  0x88 PF: > { %s309_s20 = sand.u32 1, %s656_s9   ;;  %p926_p1 = scmp.ne.s32.totalorder %s920_s26, 0 }
  0x89   : > { %p927_p3 = scmp.ge.s32.totalorder %s684_s16, 2  ;;  %s310_s21 = scalar_lea.sflag [#allocation5], %s309_s20 }
  0x8b   : > { %p433_p7 = pnand %p927_p3, %p926_p1 }
  0x8d   : > { %650 = dma.done.wait (!%p433_p7), %s310_s21, 128  }
  0x8e   : > { %652 = vsyncadd (!%p433_p7), %s310_s21, 4294967168  ;;  %s21_s16 = sadd.s32 1, %s684_s16   ;;  %s928_s9 = smov %s660_s10 }
  0x8f   : > { %p18_p13 = scmp.ge.s32.totalorder %s21_s16, 4   ;;  %s929_s10 = smov %s664_s11 }
  0x90   : > { %s930_s11 = smov %s765_s24  ;;  %s931_s12 = smov %s672_s13 }
  0x91   : > { %s902_s13 = smov 0   ;;  %s932_s14 = smov %s680_s15 }
  0x92   : > { %s933_s15 = smov %s935_s19  ;;  %20 = sbr.rel (!%p18_p13) target bundleno = 9 (0x9), region = 98 }
  0x99   :  { %315 = vsyncpa [#allocation4], 1 }
  0x9a   :  { %317 = vsyncpa [#allocation4 + $0x1], 1 }
  0x9b   :  { %318 = vsyncpa [#allocation7], 1 }
  0x9c   :  { %320 = vsyncpa [#allocation7 + $0x1], 1 }
  0x9d   :  { %321 = vsyncpa [#allocation5], 1 }
  0x9e   :  { %323 = vsyncpa [#allocation5 + $0x1], 1 }

</bundles_post_ra>
